<compile_context>
chip_gen: v5e
topology: v5e:2x2
jax: 0.10.0
libtpu: 0.0.40
codegen_flags: <defaults>
</compile_context>

<pallas_src>
import jax
import jax.numpy as jnp
from jax.experimental import pallas as pl
from jax.experimental.pallas import tpu as pltpu

_LANE = 128
_SUBLANE = 8
# ~2 MiB per tile buffer: with double-buffered input + (aliased) output that is
# well under the scoped VMEM defaults on every generation (v5e 16 MiB, v6e/v7x 32 MiB).
_TARGET_TILE_BYTES = 2 * 1024 * 1024


def encoder_forward(x: jax.Array) -> jax.Array:
    """Faithful forward of the empty reference module.

    The reference `forward` performs no computation, so the cheapest correct
    implementation is to return the activation untouched — no kernel launch,
    no HBM round trip (per performance review, target: all generations).
    """
    return x


def _copy_kernel(x_ref, o_ref):
    # Pure pass-through: the empty reference forward defines no transformation.
    o_ref[...] = x_ref[...]


def _choose_tiling(total_elems: int, itemsize: int):
    """Pick a lane-dense (rows, cols, row_block) tiling for a flat identity copy."""
    cols = None
    for cand in (2048, 1024, 512, 256, 128):  # biggest lane-dense width that divides total
        if total_elems % cand == 0:
            cols = cand
            break
    if cols is None:
        return None
    rows = total_elems // cols

    want_rows = max(1, _TARGET_TILE_BYTES // (cols * itemsize))
    if rows <= want_rows:
        row_block = rows                      # single tile covers full row extent (legal)
    else:
        row_block = max(_SUBLANE, (want_rows // _SUBLANE) * _SUBLANE)
        while rows % row_block != 0:          # grid must tile the rows exactly
            row_block -= _SUBLANE
            if row_block < _SUBLANE:
                row_block = rows
                break
    return rows, cols, row_block


def encoder_identity_pallas(x: jax.Array) -> jax.Array:
    """Optional Pallas identity copy (structural demo; `encoder_forward` skips it).

    Lane-dense 2D tiling, ~2 MiB tiles, in-place via input/output aliasing, and a
    parallel row-tile grid axis (shards across v7x's two TensorCores).
    """
    tiling = _choose_tiling(x.size, x.dtype.itemsize)
    if tiling is None:
        # TODO(synk): total element count not a multiple of 128 lanes — nothing worth
        #             tiling for an identity; fall back to the zero-cost path.
        return x

    rows, cols, row_block = tiling
    x2d = x.reshape(rows, cols)               # contiguous, lane-dense last dim
    grid = (rows // row_block,)

    copy = pl.pallas_call(
        _copy_kernel,
        out_shape=jax.ShapeDtypeStruct((rows, cols), x.dtype),
        grid_spec=pltpu.PrefetchScalarGridSpec(
            num_scalar_prefetch=0,
            grid=grid,
            in_specs=[pl.BlockSpec((row_block, cols), lambda i: (i, 0))],
            out_specs=pl.BlockSpec((row_block, cols), lambda i: (i, 0)),
        ),
        input_output_aliases={0: 0},           # write output in place of the input
        compiler_params=pltpu.CompilerParams(
            dimension_semantics=("parallel",)  # row-tile axis: megacore-shardable on v7x
        ),
    )

    # Donate the (private) working buffer so the alias is honored without a
    # defensive XLA copy; the caller's `x` is untouched.
    run = jax.jit(copy, donate_argnums=(0,))
    y2d = run(jnp.copy(x2d))
    return y2d.reshape(x.shape)


if __name__ == "__main__":
    key = jax.random.PRNGKey(0)
    # Small shapes consistent with an encoder-style activation tensor (NCHW).
    x = jax.random.normal(key, (2, 4, 16, 16), dtype=jnp.float32)

    # Faithful forward: empty module -> no compute, no kernel launch.
    y = encoder_forward(x)
    jax.block_until_ready(y)
    assert y.shape == x.shape
    assert jnp.array_equal(y, x)

    # Structural Pallas path (optimized identity copy), validated too.
    y_k = encoder_identity_pallas(x)
    jax.block_until_ready(y_k)
    assert y_k.shape == x.shape
    assert jnp.array_equal(y_k, x)

    print("KERNEL_OK")
</pallas_src>

<mosaic_0001>
module attributes {stable_mosaic.version = 11 : i64} {
  func.func @_copy_kernel(%arg0: i32, %arg1: memref<1x2048xf32, #tpu.memory_space<vmem>>, %arg2: memref<1x2048xf32, #tpu.memory_space<vmem>>) attributes {dimension_semantics = [#tpu.dimension_semantics<parallel>], iteration_bounds = array<i64: 1>, scalar_prefetch = 0 : i64, scratch_operands = 0 : i64, tpu.core_type = #tpu.core_type<tc>, window_params = [{transform_indices = @transform_0, window_bounds = array<i64: 1, 2048>}, {transform_indices = @transform_1, window_bounds = array<i64: 1, 2048>}]} {
    %c0 = arith.constant 0 : index
    %c0_0 = arith.constant 0 : index
    %0 = vector.load %arg1[%c0, %c0_0] : memref<1x2048xf32, #tpu.memory_space<vmem>>, vector<1x2048xf32>
    %c0_1 = arith.constant 0 : index
    %c0_2 = arith.constant 0 : index
    %1 = vector.load %arg2[%c0_1, %c0_2] : memref<1x2048xf32, #tpu.memory_space<vmem>>, vector<1x2048xf32>
    tpu.vector_store %arg2[%c0_1, %c0_2], %0 {strides = array<i32>} : memref<1x2048xf32, #tpu.memory_space<vmem>>, vector<1x2048xf32>,
    return
  }
  func.func @transform_0(%arg0: i32) -> (i32, i32) {
    %c0_i32 = arith.constant 0 : i32
    %c0_i32_0 = arith.constant 0 : i32
    return %arg0, %c0_i32 : i32, i32
  }
  func.func @transform_1(%arg0: i32) -> (i32, i32) {
    %c0_i32 = arith.constant 0 : i32
    %c0_i32_0 = arith.constant 0 : i32
    return %arg0, %c0_i32 : i32, i32
  }
}

</mosaic_0001>

<bundles_post_ra>
// kernel: tpu_custom_call.1
= control target key start
LH: loop header
LB: loop body
LE: loop exit
PB: predicated region body
PF: predicated region fallthrough
CT: control target
= control target key end

     0   :  { %6 = vsyncpa [#allocation3], 0  ;;  %s116_s0 = inlined_call_operand.hbm [shape: f32[1,2048], index: 0, kind: input, shape index: {}, may-alias: {0,1}]   ;;  %s117_s1 = inlined_call_operand.hbm [shape: f32[1,2048], index: 1, kind: output, shape index: {}, may-alias: {0,1}]  }
   0x1   :  { %7 = vsyncpa [#allocation4], 0  ;;  %s13_s8 = sshll.u32 %s116_s0, 4  ;;  %s98_s9 = smov [#allocation2]   ;;  %s14_s8 = int_to_ptr.hbm [resolvable:$true] %s13_s8 }
   0x2   :  { %s15_s10 = sshll.u32 %s98_s9, 4  ;;  %s16_s10 = int_to_ptr.vmem [resolvable:$true] %s15_s10 }
   0x3   :  { %18 = dma.hbm_to_vmem [thread:$0]  %s14_s8, 256, %s16_s10, [#allocation3]  }
   0x4   :  { %94 = dma.done.wait [#allocation3], 256  }
   0x5   :  { %95 = vsyncadd [#allocation3], 4294967040  ;;  %s99_s11 = smov [#allocation5]   ;;  %s34_s15 = sshll.u32 %s117_s1, 4  ;;  %v23_v0 = vld [vmem:[#allocation2] sm:$0xff]  ;;  %v24_v1 = vld [vmem:[#allocation2 + $0x8] sm:$0xff]  ;;  %s35_s15 = int_to_ptr.hbm [resolvable:$true] %s34_s15 }
   0x6   :  { %s32_s12 = sshll.u32 %s99_s11, 4  ;;  %25 = vst [vmem:[#allocation5] sm:$0xff] %v23_v0  ;;  %s33_s12 = int_to_ptr.vmem [resolvable:$true] %s32_s12 }
   0x7   :  { %26 = vst [vmem:[#allocation5 + $0x8] sm:$0xff] %v24_v1 }
   0x8   :  { %37 = dma.vmem_to_hbm [thread:$0]  %s33_s12, 256, %s35_s15, [#allocation4]  }
   0x9   :  { %96 = dma.done.wait [#allocation4], 256  }
   0xa   :  { %97 = vsyncadd [#allocation4], 4294967040 }
   0xb   :  { %42 = vsyncpa [#allocation3], 1 }
   0xc   :  { %43 = vsyncpa [#allocation4], 1 }

</bundles_post_ra>
